<compile_context>
chip_gen: v5e
topology: v5e:2x2
jax: 0.10.0
libtpu: 0.0.40
codegen_flags: <defaults>
</compile_context>

<pallas_src>
import math
import functools

import jax
import jax.numpy as jnp
from jax.experimental import pallas as pl
from jax.experimental.pallas import tpu as pltpu

WHEELBASE = 2.5


# ----------------------------------------------------------------------------------
# Pallas kernel
# ----------------------------------------------------------------------------------
def _kine_transition_kernel(
    x_ref,    # [V*F + 3, TB]  MLP input: 35 state rows + 2 action rows + 1 ones row
    s_ref,    # [F, V, TB]     feature-major state planes (for kinematics)
    w1_ref,   # [H, V*F + 3]   W1^T with b1 folded into the last column
    w2_ref,   # [H, H + 1]     W2^T with b2 folded into the last column
    w3_ref,   # [2(V-1), H+1]  de-interleaved head (acc rows then steer rows), b3 folded
    out_ref,  # [F, V, TB]     next state, feature-major, batch on lanes
    *, veh_num, feat_num, dt, max_acc, max_steer,
):
    f32 = jnp.float32
    V = veh_num
    state_dim = veh_num * feat_num

    x = x_ref[...].astype(f32)                       # [state_dim + 3, TB]
    tb = x.shape[1]

    def sigmoid(z):
        # 1/(1+exp(-z)) == 0.5*tanh(z/2) + 0.5  -> a single EUP push, exact.
        return 0.5 * jnp.tanh(0.5 * z) + 0.5

    # ---------------- MLP: activations are [*, B] (batch on the lane axis) --------
    h1 = sigmoid(jnp.dot(w1_ref[...].astype(f32), x,
                         preferred_element_type=f32))            # [H, TB]
    ones_row = jnp.ones((1, tb), f32)
    h1a = jnp.concatenate([h1, ones_row], axis=0)                 # [H+1, TB]
    h2 = sigmoid(jnp.dot(w2_ref[...].astype(f32), h1a,
                         preferred_element_type=f32))             # [H, TB]
    h2a = jnp.concatenate([h2, ones_row], axis=0)                 # [H+1, TB]
    raw = jnp.tanh(jnp.dot(w3_ref[...].astype(f32), h2a,
                           preferred_element_type=f32))           # [2(V-1), TB]

    # Ego control (vehicle 0) is the raw, un-normalized action; others are predicted.
    acc_ego = x[state_dim:state_dim + 1, :]                       # [1, TB]
    steer_ego = x[state_dim + 1:state_dim + 2, :]                 # [1, TB]
    acc = jnp.concatenate([acc_ego, raw[:V - 1] * max_acc], axis=0)        # [V, TB]
    steer = jnp.concatenate([steer_ego, raw[V - 1:] * max_steer], axis=0)  # [V, TB]

    # ---------------- kinematic bicycle update per (vehicle, batch) ---------------
    presence = s_ref[0].astype(f32)
    px = s_ref[1].astype(f32)
    py = s_ref[2].astype(f32)
    length = s_ref[3]
    width = s_ref[4]
    heading = s_ref[5].astype(f32)
    speed = s_ref[6].astype(f32)

    new_x = px + speed * jnp.cos(heading) * dt
    new_y = py + speed * jnp.sin(heading) * dt
    tan_steer = jnp.sin(steer) / jnp.cos(steer)        # exact (no approx reciprocal)
    new_heading = heading + speed * tan_steer * (dt / WHEELBASE)
    new_speed = speed + acc * dt

    # Vehicles with presence == 0 keep their state unchanged.
    mask = presence != 0.0
    odt = out_ref.dtype
    out_ref[0] = presence.astype(odt)
    out_ref[1] = jnp.where(mask, new_x, px).astype(odt)
    out_ref[2] = jnp.where(mask, new_y, py).astype(odt)
    out_ref[3] = length.astype(odt)
    out_ref[4] = width.astype(odt)
    out_ref[5] = jnp.where(mask, new_heading, heading).astype(odt)
    out_ref[6] = jnp.where(mask, new_speed, speed).astype(odt)


# ----------------------------------------------------------------------------------
# Wrapper
# ----------------------------------------------------------------------------------
def kine_transition(state, action, params, *, veh_num, feat_num, dt,
                    max_acc=5.0, max_steer=35 * math.pi / 180):
    """state: [B, V*F] float32 (feature-fastest), action: [B, 2] -> next state [B, V*F]."""
    assert feat_num == 7, "kinematics assumes 7 features per vehicle"
    w1, b1, w2, b2, w3, b3 = params
    B = state.shape[0]
    V, F = veh_num, feat_num
    H = w2.shape[0]
    state_dim = V * F
    f32 = jnp.float32

    # ---- lane-dense layout: batch on the last (lane) axis (free XLA glue) --------
    s_fm = jnp.transpose(state.reshape(B, V, F), (2, 1, 0))              # [F, V, B]
    x_aug = jnp.concatenate(
        [state.astype(f32), action.astype(f32), jnp.ones((B, 1), f32)], axis=-1).T
    #                                                                    # [V*F+3, B]

    # ---- weights pre-transposed (W^T) with biases folded as extra columns --------
    w1p = jnp.concatenate([w1.T, b1.T], axis=1).astype(f32)              # [H, V*F+3]
    w2p = jnp.concatenate([w2.T, b2.T], axis=1).astype(f32)              # [H, H+1]
    # De-interleave the control head: rows 0..V-2 = acc, rows V-1..2V-3 = steer.
    w3_de = jnp.concatenate([w3[:, 0::2], w3[:, 1::2]], axis=1)          # [H, 2(V-1)]
    b3_de = jnp.concatenate([b3[:, 0::2], b3[:, 1::2]], axis=1)          # [1, 2(V-1)]
    w3p = jnp.concatenate([w3_de.T, b3_de.T], axis=1).astype(f32)        # [2(V-1), H+1]

    # ---- batch block on the lane axis (full B for small batches) -----------------
    if B % 128 == 0 and B > 128:
        tb = 128
        while tb * 2 <= min(B, 1024) and B % (tb * 2) == 0:
            tb *= 2
    else:
        tb = B
    grid = (B // tb,)

    kernel = functools.partial(
        _kine_transition_kernel,
        veh_num=V, feat_num=F, dt=dt, max_acc=max_acc, max_steer=max_steer,
    )

    out_fm = pl.pallas_call(
        kernel,
        out_shape=jax.ShapeDtypeStruct((F, V, B), state.dtype),
        grid=grid,
        in_specs=[
            pl.BlockSpec((state_dim + 3, tb), lambda i: (0, i)),
            pl.BlockSpec((F, V, tb), lambda i: (0, 0, i)),
            pl.BlockSpec((H, state_dim + 3), lambda i: (0, 0)),
            pl.BlockSpec((H, H + 1), lambda i: (0, 0)),
            pl.BlockSpec((2 * (V - 1), H + 1), lambda i: (0, 0)),
        ],
        out_specs=pl.BlockSpec((F, V, tb), lambda i: (0, 0, i)),
        compiler_params=pltpu.CompilerParams(
            dimension_semantics=("parallel",)),
    )(x_aug, s_fm, w1p, w2p, w3p)

    # Back to the module's flat [B, V*F] layout (free XLA glue).
    return jnp.transpose(out_fm, (2, 1, 0)).reshape(B, state_dim)


# ----------------------------------------------------------------------------------
# Pure-JAX reference (mirrors the PyTorch forward semantics)
# ----------------------------------------------------------------------------------
def kine_transition_ref(state, action, params, *, veh_num, feat_num, dt,
                        max_acc=5.0, max_steer=35 * math.pi / 180):
    w1, b1, w2, b2, w3, b3 = params
    B = state.shape[0]
    sig = lambda z: 1.0 / (1.0 + jnp.exp(-z))

    x = jnp.concatenate([state, action], axis=-1)
    h1 = sig(x @ w1 + b1)
    h2 = sig(h1 @ w2 + b2)
    raw = jnp.tanh(h2 @ w3 + b3)
    ctrl_other = raw.reshape(B, veh_num - 1, 2) * jnp.array([max_acc, max_steer])
    controls = jnp.concatenate([action.reshape(B, 1, 2), ctrl_other], axis=1)

    s3 = state.reshape(B, veh_num, feat_num)
    presence, px, py, length, width, heading, speed = [s3[:, :, i] for i in range(7)]
    acc, steer = controls[:, :, 0], controls[:, :, 1]

    new_x = px + speed * jnp.cos(heading) * dt
    new_y = py + speed * jnp.sin(heading) * dt
    new_heading = heading + speed * jnp.tan(steer) / WHEELBASE * dt
    new_speed = speed + acc * dt

    mask = presence != 0.0
    new_x = jnp.where(mask, new_x, px)
    new_y = jnp.where(mask, new_y, py)
    new_heading = jnp.where(mask, new_heading, heading)
    new_speed = jnp.where(mask, new_speed, speed)

    out = jnp.stack([presence, new_x, new_y, length, width, new_heading, new_speed], -1)
    return out.reshape(B, veh_num * feat_num)


# ----------------------------------------------------------------------------------
# Main
# ----------------------------------------------------------------------------------
if __name__ == "__main__":
    B = 2
    VEH_NUM = 5        # state_veh_num
    FEAT_NUM = 7       # presence, x, y, length, width, heading, speed
    ACTION_DIM = 2     # acc, steer
    HIDDEN = 32
    DT = 0.1

    in_dim = VEH_NUM * FEAT_NUM + ACTION_DIM
    out_dim = (VEH_NUM - 1) * 2

    key = jax.random.PRNGKey(0)
    keys = jax.random.split(key, 10)

    def init_linear(kw, kb, fan_in, fan_out):
        bound = 1.0 / math.sqrt(fan_in)
        w = jax.random.uniform(kw, (fan_in, fan_out), jnp.float32, -bound, bound)
        b = jax.random.uniform(kb, (1, fan_out), jnp.float32, -bound, bound)
        return w, b

    w1, b1 = init_linear(keys[0], keys[1], in_dim, HIDDEN)
    w2, b2 = init_linear(keys[2], keys[3], HIDDEN, HIDDEN)
    w3, b3 = init_linear(keys[4], keys[5], HIDDEN, out_dim)
    params = (w1, b1, w2, b2, w3, b3)

    # Example state: [presence, x, y, length, width, heading, speed] per vehicle.
    presence = jnp.array([[1.0, 1.0, 0.0, 1.0, 1.0],
                          [1.0, 0.0, 1.0, 1.0, 1.0]], jnp.float32)     # [B, V]
    feats = jax.random.uniform(keys[6], (B, VEH_NUM, FEAT_NUM - 1), jnp.float32, -1.0, 1.0)
    feats = feats.at[:, :, 5].set(jnp.abs(feats[:, :, 5]) * 10.0)      # speed >= 0
    state3 = jnp.concatenate([presence[:, :, None], feats], axis=-1)   # [B, V, F]
    state = state3.reshape(B, VEH_NUM * FEAT_NUM)                      # [B, V*F]
    action = jax.random.uniform(keys[7], (B, ACTION_DIM), jnp.float32, -1.0, 1.0)

    out = kine_transition(state, action, params,
                          veh_num=VEH_NUM, feat_num=FEAT_NUM, dt=DT)
    out = jax.block_until_ready(out)

    ref = kine_transition_ref(state, action, params,
                              veh_num=VEH_NUM, feat_num=FEAT_NUM, dt=DT)
    assert out.shape == (B, VEH_NUM * FEAT_NUM)
    # No approx reciprocals anymore; tolerance only covers MXU/EUP vs XLA rounding.
    assert jnp.allclose(out, ref, atol=1e-3, rtol=1e-3), "mismatch vs pure-JAX reference"

    print("KERNEL_OK")
</pallas_src>

<mosaic_0001>
module attributes {stable_mosaic.version = 11 : i64} {
  func.func @_kine_transition_kernel(%arg0: i32, %arg1: memref<38x2xf32, #tpu.memory_space<vmem>>, %arg2: memref<7x5x2xf32, #tpu.memory_space<vmem>>, %arg3: memref<32x38xf32, #tpu.memory_space<vmem>>, %arg4: memref<32x33xf32, #tpu.memory_space<vmem>>, %arg5: memref<8x33xf32, #tpu.memory_space<vmem>>, %arg6: memref<7x5x2xf32, #tpu.memory_space<vmem>>) attributes {dimension_semantics = [#tpu.dimension_semantics<parallel>], iteration_bounds = array<i64: 1>, scalar_prefetch = 0 : i64, scratch_operands = 0 : i64, tpu.core_type = #tpu.core_type<tc>, window_params = [{transform_indices = @transform_0, window_bounds = array<i64: 38, 2>}, {transform_indices = @transform_1, window_bounds = array<i64: 7, 5, 2>}, {pipeline_mode = #tpu.pipeline_mode<synchronous>, transform_indices = @transform_2, window_bounds = array<i64: 32, 38>}, {pipeline_mode = #tpu.pipeline_mode<synchronous>, transform_indices = @transform_3, window_bounds = array<i64: 32, 33>}, {pipeline_mode = #tpu.pipeline_mode<synchronous>, transform_indices = @transform_4, window_bounds = array<i64: 8, 33>}, {transform_indices = @transform_5, window_bounds = array<i64: 7, 5, 2>}]} {
    %c0 = arith.constant 0 : index
    %c0_0 = arith.constant 0 : index
    %0 = vector.load %arg1[%c0, %c0_0] : memref<38x2xf32, #tpu.memory_space<vmem>>, vector<38x2xf32>
    %c0_1 = arith.constant 0 : index
    %c0_2 = arith.constant 0 : index
    %1 = vector.load %arg3[%c0_1, %c0_2] : memref<32x38xf32, #tpu.memory_space<vmem>>, vector<32x38xf32>
    %cst = arith.constant dense<0.000000e+00> : vector<32x2xf32>
    %2 = tpu.matmul %1, %0, %cst {dimension_numbers = #tpu.dot_dimension_numbers<[1], [0], [0], [1], [0, 0, 1, 1], [], []>} : vector<32x38xf32>, vector<38x2xf32>, vector<32x2xf32> -> vector<32x2xf32>
    %cst_3 = arith.constant 5.000000e-01 : f32
    %3 = vector.broadcast %cst_3 : f32 to vector<32x2xf32>
    %4 = arith.mulf %3, %2 : vector<32x2xf32>
    %5 = math.tanh %4 : vector<32x2xf32>
    %cst_4 = arith.constant 5.000000e-01 : f32
    %6 = vector.broadcast %cst_4 : f32 to vector<32x2xf32>
    %7 = arith.mulf %6, %5 : vector<32x2xf32>
    %cst_5 = arith.constant 5.000000e-01 : f32
    %8 = vector.broadcast %cst_5 : f32 to vector<32x2xf32>
    %9 = arith.addf %7, %8 : vector<32x2xf32>
    %cst_6 = arith.constant 1.000000e+00 : f32
    %10 = vector.broadcast %cst_6 : f32 to vector<1x2xf32>
    %11 = tpu.concatenate %9, %10 in 0 : vector<32x2xf32>, vector<1x2xf32> -> vector<33x2xf32>
    %c0_7 = arith.constant 0 : index
    %c0_8 = arith.constant 0 : index
    %12 = vector.load %arg4[%c0_7, %c0_8] : memref<32x33xf32, #tpu.memory_space<vmem>>, vector<32x33xf32>
    %cst_9 = arith.constant dense<0.000000e+00> : vector<32x2xf32>
    %13 = tpu.matmul %12, %11, %cst_9 {dimension_numbers = #tpu.dot_dimension_numbers<[1], [0], [0], [1], [0, 0, 1, 1], [], []>} : vector<32x33xf32>, vector<33x2xf32>, vector<32x2xf32> -> vector<32x2xf32>
    %cst_10 = arith.constant 5.000000e-01 : f32
    %14 = vector.broadcast %cst_10 : f32 to vector<32x2xf32>
    %15 = arith.mulf %14, %13 : vector<32x2xf32>
    %16 = math.tanh %15 : vector<32x2xf32>
    %cst_11 = arith.constant 5.000000e-01 : f32
    %17 = vector.broadcast %cst_11 : f32 to vector<32x2xf32>
    %18 = arith.mulf %17, %16 : vector<32x2xf32>
    %cst_12 = arith.constant 5.000000e-01 : f32
    %19 = vector.broadcast %cst_12 : f32 to vector<32x2xf32>
    %20 = arith.addf %18, %19 : vector<32x2xf32>
    %21 = tpu.concatenate %20, %10 in 0 : vector<32x2xf32>, vector<1x2xf32> -> vector<33x2xf32>
    %c0_13 = arith.constant 0 : index
    %c0_14 = arith.constant 0 : index
    %22 = vector.load %arg5[%c0_13, %c0_14] : memref<8x33xf32, #tpu.memory_space<vmem>>, vector<8x33xf32>
    %cst_15 = arith.constant dense<0.000000e+00> : vector<8x2xf32>
    %23 = tpu.matmul %22, %21, %cst_15 {dimension_numbers = #tpu.dot_dimension_numbers<[1], [0], [0], [1], [0, 0, 1, 1], [], []>} : vector<8x33xf32>, vector<33x2xf32>, vector<8x2xf32> -> vector<8x2xf32>
    %24 = math.tanh %23 : vector<8x2xf32>
    %25 = vector.extract_strided_slice %0 {offsets = [35, 0], sizes = [1, 2], strides = [1, 1]} : vector<38x2xf32> to vector<1x2xf32>
    %26 = vector.extract_strided_slice %0 {offsets = [36, 0], sizes = [1, 2], strides = [1, 1]} : vector<38x2xf32> to vector<1x2xf32>
    %27 = vector.extract_strided_slice %24 {offsets = [0, 0], sizes = [4, 2], strides = [1, 1]} : vector<8x2xf32> to vector<4x2xf32>
    %cst_16 = arith.constant 5.000000e+00 : f32
    %28 = vector.broadcast %cst_16 : f32 to vector<4x2xf32>
    %29 = arith.mulf %27, %28 : vector<4x2xf32>
    %30 = tpu.concatenate %25, %29 in 0 : vector<1x2xf32>, vector<4x2xf32> -> vector<5x2xf32>
    %31 = vector.extract_strided_slice %24 {offsets = [4, 0], sizes = [4, 2], strides = [1, 1]} : vector<8x2xf32> to vector<4x2xf32>
    %cst_17 = arith.constant 0.610865235 : f32
    %32 = vector.broadcast %cst_17 : f32 to vector<4x2xf32>
    %33 = arith.mulf %31, %32 : vector<4x2xf32>
    %34 = tpu.concatenate %26, %33 in 0 : vector<1x2xf32>, vector<4x2xf32> -> vector<5x2xf32>
    %c0_18 = arith.constant 0 : index
    %c0_19 = arith.constant 0 : index
    %c0_20 = arith.constant 0 : index
    %35 = vector.load %arg2[%c0_18, %c0_19, %c0_20] : memref<7x5x2xf32, #tpu.memory_space<vmem>>, vector<1x5x2xf32>
    %36 = vector.shape_cast %35 : vector<1x5x2xf32> to vector<5x2xf32>
    %c1 = arith.constant 1 : index
    %c0_21 = arith.constant 0 : index
    %c0_22 = arith.constant 0 : index
    %37 = vector.load %arg2[%c1, %c0_21, %c0_22] : memref<7x5x2xf32, #tpu.memory_space<vmem>>, vector<1x5x2xf32>
    %38 = vector.shape_cast %37 : vector<1x5x2xf32> to vector<5x2xf32>
    %c2 = arith.constant 2 : index
    %c0_23 = arith.constant 0 : index
    %c0_24 = arith.constant 0 : index
    %39 = vector.load %arg2[%c2, %c0_23, %c0_24] : memref<7x5x2xf32, #tpu.memory_space<vmem>>, vector<1x5x2xf32>
    %40 = vector.shape_cast %39 : vector<1x5x2xf32> to vector<5x2xf32>
    %c3 = arith.constant 3 : index
    %c0_25 = arith.constant 0 : index
    %c0_26 = arith.constant 0 : index
    %41 = vector.load %arg2[%c3, %c0_25, %c0_26] : memref<7x5x2xf32, #tpu.memory_space<vmem>>, vector<1x5x2xf32>
    %42 = vector.shape_cast %41 : vector<1x5x2xf32> to vector<5x2xf32>
    %c4 = arith.constant 4 : index
    %c0_27 = arith.constant 0 : index
    %c0_28 = arith.constant 0 : index
    %43 = vector.load %arg2[%c4, %c0_27, %c0_28] : memref<7x5x2xf32, #tpu.memory_space<vmem>>, vector<1x5x2xf32>
    %44 = vector.shape_cast %43 : vector<1x5x2xf32> to vector<5x2xf32>
    %c5 = arith.constant 5 : index
    %c0_29 = arith.constant 0 : index
    %c0_30 = arith.constant 0 : index
    %45 = vector.load %arg2[%c5, %c0_29, %c0_30] : memref<7x5x2xf32, #tpu.memory_space<vmem>>, vector<1x5x2xf32>
    %46 = vector.shape_cast %45 : vector<1x5x2xf32> to vector<5x2xf32>
    %c6 = arith.constant 6 : index
    %c0_31 = arith.constant 0 : index
    %c0_32 = arith.constant 0 : index
    %47 = vector.load %arg2[%c6, %c0_31, %c0_32] : memref<7x5x2xf32, #tpu.memory_space<vmem>>, vector<1x5x2xf32>
    %48 = vector.shape_cast %47 : vector<1x5x2xf32> to vector<5x2xf32>
    %49 = math.cos %46 : vector<5x2xf32>
    %50 = arith.mulf %48, %49 : vector<5x2xf32>
    %cst_33 = arith.constant 1.000000e-01 : f32
    %51 = vector.broadcast %cst_33 : f32 to vector<5x2xf32>
    %52 = arith.mulf %50, %51 : vector<5x2xf32>
    %53 = arith.addf %38, %52 : vector<5x2xf32>
    %54 = math.sin %46 : vector<5x2xf32>
    %55 = arith.mulf %48, %54 : vector<5x2xf32>
    %cst_34 = arith.constant 1.000000e-01 : f32
    %56 = vector.broadcast %cst_34 : f32 to vector<5x2xf32>
    %57 = arith.mulf %55, %56 : vector<5x2xf32>
    %58 = arith.addf %40, %57 : vector<5x2xf32>
    %59 = math.sin %34 : vector<5x2xf32>
    %60 = math.cos %34 : vector<5x2xf32>
    %61 = arith.divf %59, %60 : vector<5x2xf32>
    %62 = arith.mulf %48, %61 : vector<5x2xf32>
    %cst_35 = arith.constant 4.000000e-02 : f32
    %63 = vector.broadcast %cst_35 : f32 to vector<5x2xf32>
    %64 = arith.mulf %62, %63 : vector<5x2xf32>
    %65 = arith.addf %46, %64 : vector<5x2xf32>
    %cst_36 = arith.constant 1.000000e-01 : f32
    %66 = vector.broadcast %cst_36 : f32 to vector<5x2xf32>
    %67 = arith.mulf %30, %66 : vector<5x2xf32>
    %68 = arith.addf %48, %67 : vector<5x2xf32>
    %cst_37 = arith.constant 0.000000e+00 : f32
    %69 = vector.broadcast %cst_37 : f32 to vector<5x2xf32>
    %70 = arith.cmpf one, %36, %69 : vector<5x2xf32>
    %c0_38 = arith.constant 0 : index
    %c0_39 = arith.constant 0 : index
    %c0_40 = arith.constant 0 : index
    %71 = vector.load %arg6[%c0_38, %c0_39, %c0_40] : memref<7x5x2xf32, #tpu.memory_space<vmem>>, vector<1x5x2xf32>
    %72 = vector.shape_cast %71 : vector<1x5x2xf32> to vector<5x2xf32>
    %73 = vector.shape_cast %36 : vector<5x2xf32> to vector<1x5x2xf32>
    tpu.vector_store %arg6[%c0_38, %c0_39, %c0_40], %73 {strides = array<i32>} : memref<7x5x2xf32, #tpu.memory_space<vmem>>, vector<1x5x2xf32>,
    %74 = arith.select %70, %53, %38 : vector<5x2xi1>, vector<5x2xf32>
    %c1_41 = arith.constant 1 : index
    %c0_42 = arith.constant 0 : index
    %c0_43 = arith.constant 0 : index
    %75 = vector.load %arg6[%c1_41, %c0_42, %c0_43] : memref<7x5x2xf32, #tpu.memory_space<vmem>>, vector<1x5x2xf32>
    %76 = vector.shape_cast %75 : vector<1x5x2xf32> to vector<5x2xf32>
    %77 = vector.shape_cast %74 : vector<5x2xf32> to vector<1x5x2xf32>
    tpu.vector_store %arg6[%c1_41, %c0_42, %c0_43], %77 {strides = array<i32>} : memref<7x5x2xf32, #tpu.memory_space<vmem>>, vector<1x5x2xf32>,
    %78 = arith.select %70, %58, %40 : vector<5x2xi1>, vector<5x2xf32>
    %c2_44 = arith.constant 2 : index
    %c0_45 = arith.constant 0 : index
    %c0_46 = arith.constant 0 : index
    %79 = vector.load %arg6[%c2_44, %c0_45, %c0_46] : memref<7x5x2xf32, #tpu.memory_space<vmem>>, vector<1x5x2xf32>
    %80 = vector.shape_cast %79 : vector<1x5x2xf32> to vector<5x2xf32>
    %81 = vector.shape_cast %78 : vector<5x2xf32> to vector<1x5x2xf32>
    tpu.vector_store %arg6[%c2_44, %c0_45, %c0_46], %81 {strides = array<i32>} : memref<7x5x2xf32, #tpu.memory_space<vmem>>, vector<1x5x2xf32>,
    %c3_47 = arith.constant 3 : index
    %c0_48 = arith.constant 0 : index
    %c0_49 = arith.constant 0 : index
    %82 = vector.load %arg6[%c3_47, %c0_48, %c0_49] : memref<7x5x2xf32, #tpu.memory_space<vmem>>, vector<1x5x2xf32>
    %83 = vector.shape_cast %82 : vector<1x5x2xf32> to vector<5x2xf32>
    %84 = vector.shape_cast %42 : vector<5x2xf32> to vector<1x5x2xf32>
    tpu.vector_store %arg6[%c3_47, %c0_48, %c0_49], %84 {strides = array<i32>} : memref<7x5x2xf32, #tpu.memory_space<vmem>>, vector<1x5x2xf32>,
    %c4_50 = arith.constant 4 : index
    %c0_51 = arith.constant 0 : index
    %c0_52 = arith.constant 0 : index
    %85 = vector.load %arg6[%c4_50, %c0_51, %c0_52] : memref<7x5x2xf32, #tpu.memory_space<vmem>>, vector<1x5x2xf32>
    %86 = vector.shape_cast %85 : vector<1x5x2xf32> to vector<5x2xf32>
    %87 = vector.shape_cast %44 : vector<5x2xf32> to vector<1x5x2xf32>
    tpu.vector_store %arg6[%c4_50, %c0_51, %c0_52], %87 {strides = array<i32>} : memref<7x5x2xf32, #tpu.memory_space<vmem>>, vector<1x5x2xf32>,
    %88 = arith.select %70, %65, %46 : vector<5x2xi1>, vector<5x2xf32>
    %c5_53 = arith.constant 5 : index
    %c0_54 = arith.constant 0 : index
    %c0_55 = arith.constant 0 : index
    %89 = vector.load %arg6[%c5_53, %c0_54, %c0_55] : memref<7x5x2xf32, #tpu.memory_space<vmem>>, vector<1x5x2xf32>
    %90 = vector.shape_cast %89 : vector<1x5x2xf32> to vector<5x2xf32>
    %91 = vector.shape_cast %88 : vector<5x2xf32> to vector<1x5x2xf32>
    tpu.vector_store %arg6[%c5_53, %c0_54, %c0_55], %91 {strides = array<i32>} : memref<7x5x2xf32, #tpu.memory_space<vmem>>, vector<1x5x2xf32>,
    %92 = arith.select %70, %68, %48 : vector<5x2xi1>, vector<5x2xf32>
    %c6_56 = arith.constant 6 : index
    %c0_57 = arith.constant 0 : index
    %c0_58 = arith.constant 0 : index
    %93 = vector.load %arg6[%c6_56, %c0_57, %c0_58] : memref<7x5x2xf32, #tpu.memory_space<vmem>>, vector<1x5x2xf32>
    %94 = vector.shape_cast %93 : vector<1x5x2xf32> to vector<5x2xf32>
    %95 = vector.shape_cast %92 : vector<5x2xf32> to vector<1x5x2xf32>
    tpu.vector_store %arg6[%c6_56, %c0_57, %c0_58], %95 {strides = array<i32>} : memref<7x5x2xf32, #tpu.memory_space<vmem>>, vector<1x5x2xf32>,
    return
  }
  func.func @transform_0(%arg0: i32) -> (i32, i32) {
    %c0_i32 = arith.constant 0 : i32
    %c0_i32_0 = arith.constant 0 : i32
    return %c0_i32, %arg0 : i32, i32
  }
  func.func @transform_1(%arg0: i32) -> (i32, i32, i32) {
    %c0_i32 = arith.constant 0 : i32
    %c0_i32_0 = arith.constant 0 : i32
    %c0_i32_1 = arith.constant 0 : i32
    return %c0_i32, %c0_i32_0, %arg0 : i32, i32, i32
  }
  func.func @transform_2(%arg0: i32) -> (i32, i32) {
    %c0_i32 = arith.constant 0 : i32
    %c0_i32_0 = arith.constant 0 : i32
    %c0_i32_1 = arith.constant 0 : i32
    return %c0_i32, %c0_i32_0 : i32, i32
  }
  func.func @transform_3(%arg0: i32) -> (i32, i32) {
    %c0_i32 = arith.constant 0 : i32
    %c0_i32_0 = arith.constant 0 : i32
    %c0_i32_1 = arith.constant 0 : i32
    return %c0_i32, %c0_i32_0 : i32, i32
  }
  func.func @transform_4(%arg0: i32) -> (i32, i32) {
    %c0_i32 = arith.constant 0 : i32
    %c0_i32_0 = arith.constant 0 : i32
    %c0_i32_1 = arith.constant 0 : i32
    return %c0_i32, %c0_i32_0 : i32, i32
  }
  func.func @transform_5(%arg0: i32) -> (i32, i32, i32) {
    %c0_i32 = arith.constant 0 : i32
    %c0_i32_0 = arith.constant 0 : i32
    %c0_i32_1 = arith.constant 0 : i32
    return %c0_i32, %c0_i32_0, %arg0 : i32, i32, i32
  }
}

</mosaic_0001>

<bundles_post_ra>
// kernel: tpu_custom_call.1
= control target key start
LH: loop header
LB: loop body
LE: loop exit
PB: predicated region body
PF: predicated region fallthrough
CT: control target
= control target key end

     0   :  { %vm42_vm0 = vcmask 1045504   ;;  %vm29_vm1 = vcmask 310272   ;;  %vm108_vm2 = vcmask 1040384   ;;  %v950_v9 = vmov 1.0   ;;  %s1323_s0 = inlined_call_operand.vmem [shape: f32[38,2], index: 0, kind: input, shape index: {}]   ;;  %s1324_s2 = inlined_call_operand.vmem [shape: f32[32,38], index: 2, kind: input, shape index: {}]   ;;  %s1325_s3 = inlined_call_operand.vmem [shape: f32[32,33], index: 3, kind: input, shape index: {}]   ;;  %s1326_s4 = inlined_call_operand.vmem [shape: f32[8,33], index: 4, kind: input, shape index: {}]   ;;  %s1327_s1 = inlined_call_operand.vmem [shape: f32[7,5,2], index: 1, kind: input, shape index: {}]   ;;  %s1328_s5 = inlined_call_operand.vmem [shape: f32[7,5,2], index: 5, kind: output, shape index: {}]  }
   0x1   :  { %v991_v0 = vld [vmem:[%s1323_s0 + $0x20] sm:$0x3f]  ;;  %v23_v1 = vld [vmem:[%s1323_s0 + $0x18] sm:$0xff]  ;;  %v22_v2 = vld [vmem:[%s1323_s0 + $0x10] sm:$0xff]  ;;  %917 = vmatpush.msk.msra.mxu1 %vm108_vm2, %v950_v9  ;;  %886 = vmatpush.msk.msra.mxu2 %vm108_vm2, %v950_v9  ;;  %vm95_vm3 = vcmask 269312   ;;  %vm854_vm8 = vcmask 12288  }
   0x2   :  { %912 = vmatpush.msk.msra.mxu3 %vm42_vm0, %v991_v0  ;;  %876 = vmatpush.msk.msra.mxu0 %vm42_vm0, %v991_v0  ;;  %v21_v3 = vld [vmem:[%s1323_s0 + $0x8] sm:$0xff]  ;;  %v20_v4 = vld [vmem:[%s1323_s0] sm:$0xff]  ;;  %v27_v7 = vld [vmem:[%s1324_s2 + $0x10] sm:$0xff] }
   0x3   :  { %v26_v5 = vld [vmem:[%s1324_s2 + $0x8] sm:$0xff]  ;;  %v25_v6 = vld [vmem:[%s1324_s2] sm:$0xff]  ;;  %v28_v8 = vld [vmem:[%s1324_s2 + $0x18] sm:$0xff] }
   0x4   :  { %913 = vmatpush.msra.mxu3 %v23_v1  ;;  %58 = vmatpush.msra.mxu0 %v23_v1  ;;  %v92_v30 = vld [vmem:[%s1325_s3 + $0x8] sm:$0xff]  ;;  %v91_v31 = vld [vmem:[%s1325_s3] sm:$0xff]  ;;  %v93_v32 = vld [vmem:[%s1325_s3 + $0x10] sm:$0xff] }
   0x5   :  { %v94_v33 = vld [vmem:[%s1325_s3 + $0x18] sm:$0xff]  ;;  %v157_v54 = vld [vmem:[%s1326_s4] sm:$0xff]  ;;  %v1045_v55 = vld [vmem:[%s1327_s1 + $0x28] sm:$0x1f] }
   0x6   :  { %914 = vmatpush.msra.mxu3 %v22_v2  ;;  %59 = vmatpush.msra.mxu0 %v22_v2  ;;  %v212_v56 = vand.u32 2139095040, %v1045_v55  ;;  %v209_v58 = vand.u32 2147483647, %v1045_v55 }
   0x8   :  { %915 = vmatpush.msra.mxu3 %v21_v3  ;;  %60 = vmatpush.msra.mxu0 %v21_v3  ;;  %v213_v57 = vshrl.u32 %v212_v56, 23  ;;  %v216_v61 = vand.u32 8388607, %v209_v58 }
   0xa   :  { %916 = vmatpush.msra.mxu3 %v20_v4  ;;  %61 = vmatpush.msra.mxu0 %v20_v4  ;;  %v894_v59 = vadd.s32 4294967169, %v213_v57  ;;  %v217_v1 = vor.u32 8388608, %v216_v61  ;;  %v951_v4 = vmov 683565275  }
   0xb   :  { %878 = vmatmul.msk.f32.vlgmr.msra.gmra.mxu3 %vm29_vm1, %v26_v5  ;;  %877 = vmatmul.msk.f32.vlgmr.msra.gmra.mxu0 %vm29_vm1, %v25_v6  ;;  %v952_v6 = vmov 2475754826  }
   0xc   :  { %881 = vmatpush.msk.msrb.mxu0 %vm108_vm2, %v950_v9  ;;  %v219_v60 = vadd.s32 1, %v894_v59 }
   0xe   :  { %vm220_vm4 = vcmp.gt.s32.totalorder %v219_v60, 0 }
   0xf   :  { %v221_v62 = vsel %vm220_vm4, %v219_v60, 0 }
  0x10   :  { %v223_v63 = vand.u32 31, %v221_v62  ;;  %v1051_v2 = vshrl.u32 %v221_v62, 5 }
  0x12   :  { %v1053_v3 = vsub.s32 32, %v223_v63  ;;  %v226_v5 = vshll.u32 %v951_v4, %v223_v63  ;;  %vm241_vm5 = vcmp.lt.s32.totalorder %v1051_v2, 1  ;;  %vm244_vm6 = vcmp.lt.s32.totalorder %v1051_v2, 4 }
  0x13   :  { %879 = vmatmul.msk.f32.gmra.mxu3 %vm29_vm1, %v27_v7  ;;  %v229_v7 = vshll.u32 %v952_v6, %v223_v63  ;;  %vm243_vm7 = vcmp.lt.s32.totalorder %v1051_v2, 3  ;;  %vm242_vm9 = vcmp.lt.s32.totalorder %v1051_v2, 2 }
  0x14   :  { %v225_v59 = vshrl.u32 %v951_v4, %v1053_v3 }
  0x1b   :  { %880 = vmatmul.msk.f32.gmra.mxu3 %vm29_vm1, %v28_v8  ;;  %v953_v8 = vmov 2131351028  }
  0x1c   :  { %v232_v9 = vshll.u32 %v953_v8, %v223_v63 }
  0x88   :  { %v63_v12 = vpop.f32.mrf.mxu0 }
  0x89   :  { %v75_v13 = vmul.f32 0.5, %v63_v12  ;;  %v955_v12 = vmov 920167782  }
  0x8b   :  { %930 = vtanh.f32 %v75_v13  ;;  %v238_v13 = vshll.u32 %v955_v12, %v223_v63 }
  0x8e   :  { %v66_v10 = vpop.f32.mrf.mxu3 }
  0x8f   :  { %v76_v15 = vmul.f32 0.5, %v66_v10  ;;  %v954_v10 = vmov 2102212464  }
  0x91   :  { %v931_v18 = vpop.eup %930 }
  0x92   :  { %v83_v26 = vmul.f32 0.5, %v931_v18  ;;  %v956_v18 = vmov 1326507024  }
  0x94   :  { %v87_v29 = vadd.f32 0.5, %v83_v26  ;;  %v891_v26 = vld [vmem:[%s1327_s1 + $0x20] sm:$0x1f] }
  0x95   :  { %909 = vst.msk [vmem:[%s1328_s5 + $0x20] sm:$0x1f] %vm854_vm8, %v891_v26 }
  0x96   :  { %v69_v11 = vpop.f32.mrf.mxu3 }
  0x97   :  { %v77_v14 = vmul.f32 0.5, %v69_v11  ;;  %v235_v11 = vshll.u32 %v954_v10, %v223_v63 }
  0x99   :  { %932 = vtanh.f32 %v77_v14  ;;  %v227_v14 = vshrl.u32 %v952_v6, %v1053_v3 }
  0x9a   :  { %934 = vtanh.f32 %v76_v15  ;;  %v230_v15 = vshrl.u32 %v953_v8, %v1053_v3 }
  0x9e   :  { %v72_v16 = vpop.f32.mrf.mxu3 }
  0x9f   :  { %v78_v17 = vmul.f32 0.5, %v72_v16  ;;  %v933_v19 = vpop.eup %932  ;;  %v233_v16 = vshrl.u32 %v954_v10, %v1053_v3 }
  0xa0   :  { %v935_v20 = vpop.eup %934  ;;  %v85_v23 = vmul.f32 0.5, %v933_v19  ;;  %v239_v19 = vshrl.u32 %v956_v18, %v1053_v3 }
  0xa1   :  { %936 = vtanh.f32 %v78_v17  ;;  %v84_v25 = vmul.f32 0.5, %v935_v20  ;;  %v236_v17 = vshrl.u32 %v955_v12, %v1053_v3  ;;  %v1071_v20 = vshll.u32 %v217_v1, 8 }
  0xa2   :  { %v89_v27 = vadd.f32 0.5, %v85_v23  ;;  %v1078_v23 = vor.u32 %v230_v15, %v229_v7  ;;  %v957_v7 = vmov 0  }
  0xa3   :  { %v88_v28 = vadd.f32 0.5, %v84_v25  ;;  %v1084_v25 = vld [vmem:[%s1327_s1] sm:$0x1f] }
  0xa4   :  { %855 = vst.msk [vmem:[%s1328_s5] sm:$0x1f] %vm854_vm8, %v1084_v25  ;;  %vm853_vm14 = vcmp.ne.f32.partialorder %v1084_v25, 0.0 }
  0xa7   :  { %v937_v21 = vpop.eup %936 }
  0xa8   :  { %v86_v22 = vmul.f32 0.5, %v937_v21  ;;  %v890_v21 = vld [vmem:[%s1327_s1 + $0x18] sm:$0x1f] }
  0xa9   :  { %908 = vst.msk [vmem:[%s1328_s5 + $0x18] sm:$0x1f] %vm854_vm8, %v890_v21 }
  0xaa   :  { %v90_v24 = vadd.f32 0.5, %v86_v22  ;;  %v1076_v22 = vor.u32 %v227_v14, %v226_v5 }
  0xac   :  { %124 = vmatpush.msrb.mxu0 %v90_v24  ;;  %918 = vmatpush.msra.mxu1 %v90_v24  ;;  %v234_v24 = vor.u32 %v233_v16, %v232_v9 }
  0xae   :  { %125 = vmatpush.msrb.mxu0 %v89_v27  ;;  %919 = vmatpush.msra.mxu1 %v89_v27  ;;  %v237_v27 = vor.u32 %v236_v17, %v235_v11  ;;  %v246_v5 = vsel %vm244_vm6, %v234_v24, 2102212464 }
  0xb0   :  { %126 = vmatpush.msrb.mxu0 %v88_v28  ;;  %920 = vmatpush.msra.mxu1 %v88_v28  ;;  %v240_v28 = vor.u32 %v239_v19, %v238_v13 }
  0xb2   :  { %127 = vmatpush.msrb.mxu0 %v87_v29  ;;  %921 = vmatpush.msra.mxu1 %v87_v29 }
  0xb3   :  { %883 = vmatmul.msk.f32.vlgmr.msra.gmra.mxu1 %vm95_vm3, %v92_v30  ;;  %882 = vmatmul.msk.f32.vlgmr.msrb.gmra.mxu0 %vm95_vm3, %v91_v31  ;;  %v249_v30 = vsel %vm241_vm5, %v1076_v22, %v1078_v23  ;;  %v253_v31 = vsel %vm241_vm5, %v1078_v23, %v234_v24 }
  0xbb   :  { %884 = vmatmul.msk.f32.gmra.mxu1 %vm95_vm3, %v93_v32  ;;  %v250_v32 = vsel %vm244_vm6, %v237_v27, 920167782 }
  0xc3   :  { %885 = vmatmul.msk.f32.gmra.mxu1 %vm95_vm3, %v94_v33  ;;  %v254_v33 = vsel %vm244_vm6, %v240_v28, 1326507024  ;;  %v245_v28 = vsel %vm241_vm5, %v225_v59, %v1076_v22 }
 0x130   :  { %v132_v34 = vpop.f32.mrf.mxu1  ;;  %v129_v36 = vpop.f32.mrf.mxu0 }
 0x131   :  { %v142_v37 = vmul.f32 0.5, %v132_v34  ;;  %v141_v39 = vmul.f32 0.5, %v129_v36  ;;  %v251_v34 = vsel %vm243_vm7, %v234_v24, %v250_v32  ;;  %v258_v36 = vand.u32 65535, %v1071_v20 }
 0x133   :  { %938 = vtanh.f32 %v142_v37  ;;  %v259_v37 = vshrl.u32 %v1071_v20, 16 }
 0x138   :  { %v135_v35 = vpop.f32.mrf.mxu1 }
 0x139   :  { %v143_v38 = vmul.f32 0.5, %v135_v35  ;;  %v939_v42 = vpop.eup %938  ;;  %v255_v35 = vsel %vm243_vm7, %v237_v27, %v254_v33 }
 0x13a   :  { %v150_v49 = vmul.f32 0.5, %v939_v42 }
 0x13b   :  { %940 = vtanh.f32 %v143_v38  ;;  %v252_v38 = vsel %vm242_vm9, %v249_v30, %v251_v34  ;;  %v1145_v30 = vld [vmem:[%s1327_s1 + $0x30] sm:$0x1f] }
 0x13c   :  { %942 = vtanh.f32 %v141_v39  ;;  %v154_v52 = vadd.f32 0.5, %v150_v49  ;;  %v256_v39 = vsel %vm242_vm9, %v253_v31, %v255_v35  ;;  %v282_v42 = vand.u32 65535, %v252_v38 }
 0x13d   :  { %v247_v31 = vsel %vm243_vm7, %v1078_v23, %v246_v5 }
 0x140   :  { %v138_v40 = vpop.f32.mrf.mxu1 }
 0x141   :  { %v144_v41 = vmul.f32 0.5, %v138_v40  ;;  %v941_v43 = vpop.eup %940  ;;  %v260_v40 = vand.u32 65535, %v256_v39 }
 0x142   :  { %v943_v44 = vpop.eup %942  ;;  %v151_v47 = vmul.f32 0.5, %v941_v43  ;;  %v283_v43 = vshrl.u32 %v252_v38, 16 }
 0x143   :  { %944 = vtanh.f32 %v144_v41  ;;  %v149_v50 = vmul.f32 0.5, %v943_v44  ;;  %v261_v41 = vshrl.u32 %v256_v39, 16  ;;  %v183_v44 = vrot.slane %v991_v0, 3 }
 0x144   :  { %v155_v51 = vadd.f32 0.5, %v151_v47  ;;  %v287_v61 = vmul.u32 %v283_v43, %v259_v37 }
 0x145   :  { %v153_v53 = vadd.f32 0.5, %v149_v50  ;;  %v263_v47 = vmul.u32 %v261_v41, %v258_v36  ;;  %v284_v50 = vmul.u32 %v282_v42, %v258_v36  ;;  %v265_v56 = vmul.u32 %v261_v41, %v259_v37 }
 0x146   :  { %v248_v41 = vsel %vm242_vm9, %v245_v28, %v247_v31 }
 0x147   :  { %v266_v57 = vshll.u32 %v263_v47, 16  ;;  %v267_v14 = vshrl.u32 %v263_v47, 16 }
 0x149   :  { %v945_v45 = vpop.eup %944 }
 0x14a   :  { %v152_v46 = vmul.f32 0.5, %v945_v45  ;;  %v190_v45 = vrot.slane %v991_v0, 4 }
 0x14c   :  { %v156_v48 = vadd.f32 0.5, %v152_v46  ;;  %v262_v46 = vmul.u32 %v260_v40, %v258_v36 }
 0x14e   :  { %173 = vmatpush.msra.mxu2 %v156_v48  ;;  %v264_v48 = vmul.u32 %v260_v40, %v259_v37  ;;  %vm270_vm10 = vc.u32 %v262_v46, %v266_v57  ;;  %v272_v0 = vadd.s32 %v266_v57, %v262_v46  ;;  %v302_v46 = vmul.u32 %v1071_v20, %v248_v41 }
 0x14f   :  { %v271_v9 = vsel %vm270_vm10, 1, %v957_v7 }
 0x150   :  { %174 = vmatpush.msra.mxu2 %v155_v51  ;;  %v285_v51 = vmul.u32 %v283_v43, %v258_v36  ;;  %v268_v60 = vshll.u32 %v264_v48, 16  ;;  %v273_v3 = vadd.s32 %v271_v9, %v265_v56  ;;  %v269_v15 = vshrl.u32 %v264_v48, 16 }
 0x152   :  { %175 = vmatpush.msra.mxu2 %v154_v52  ;;  %v286_v52 = vmul.u32 %v282_v42, %v259_v37  ;;  %v288_v62 = vshll.u32 %v285_v51, 16  ;;  %vm274_vm12 = vc.u32 %v272_v0, %v268_v60 }
 0x153   :  { %v275_v16 = vsel %vm274_vm12, 1, %v957_v7  ;;  %vm211_vm12 = vcmp.lt.s32.totalorder %v1045_v55, 0 }
 0x154   :  { %176 = vmatpush.msra.mxu2 %v153_v53  ;;  %v290_v11 = vshll.u32 %v286_v52, 16  ;;  %vm292_vm11 = vc.u32 %v284_v50, %v288_v62  ;;  %v294_v19 = vadd.s32 %v288_v62, %v284_v50  ;;  %v277_v24 = vadd.s32 %v275_v16, %v273_v3 }
 0x155   :  { %887 = vmatmul.msk.f32.vlgmr.msra.gmra.mxu2 %vm95_vm3, %v157_v54  ;;  %v293_v17 = vsel %vm292_vm11, 1, %v957_v7  ;;  %v291_v35 = vshrl.u32 %v286_v52, 16 }
 0x156   :  { %v295_v26 = vadd.s32 %v293_v17, %v287_v61  ;;  %vm296_vm13 = vc.u32 %v294_v19, %v290_v11  ;;  %v278_v32 = vadd.s32 %v277_v24, %v267_v14  ;;  %v1154_v38 = vadd.s32 %v294_v19, %v290_v11 }
 0x157   :  { %v297_v33 = vsel %vm296_vm13, 1, %v957_v7  ;;  %vm1251_vm13 = vcmp.le.f32.partialorder %v209_v58, 0.7853982 }
 0x158   :  { %v299_v36 = vadd.s32 %v297_v33, %v295_v26  ;;  %v1152_v22 = vadd.s32 %v278_v32, %v269_v15 }
 0x15a   :  { %vm304_vm15 = vc.u32 %v1152_v22, %v1154_v38 }
 0x1d8   :  { %v178_v29 = vpop.f32.mrf.mxu2 }
 0x1d9   :  { %946 = vtanh.f32 %v178_v29  ;;  %v289_v29 = vshrl.u32 %v285_v51, 16 }
 0x1db   :  { %v300_v23 = vadd.s32 %v299_v36, %v289_v29 }
 0x1df   :  { %v947_v49 = vpop.eup %946 }
 0x1e0   :  { %v182_v53 = vmul.f32 5.0, %v947_v49  ;;  %v189_v54 = vmul.f32 0.61086524, %v947_v49 }
 0x1e2   :  { %v186_v63 = vrot.slane %v182_v53, 7  ;;  %v193_v1 = vrot.slane %v189_v54, 3 }
 0x1e4   :  { %v1133_v13 = vsel %vm108_vm2, %v190_v45, %v193_v1  ;;  %v188_v21 = vsel %vm108_vm2, %v183_v44, %v186_v63  ;;  %v301_v44 = vadd.s32 %v300_v23, %v291_v35 }
 0x1e5   :  { %v527_v27 = vand.u32 2139095040, %v1133_v13  ;;  %v851_v37 = vmul.f32 0.1, %v188_v21  ;;  %v524_v39 = vand.u32 2147483647, %v1133_v13 }
 0x1e6   :  { %v305_v2 = vadd.s32 1, %v301_v44 }
 0x1e7   :  { %v528_v34 = vshrl.u32 %v527_v27, 23  ;;  %v852_v42 = vadd.f32 %v1145_v30, %v851_v37  ;;  %v531_v47 = vand.u32 8388607, %v524_v39 }
 0x1e8   :  { %v306_v50 = vsel %vm304_vm15, %v305_v2, %v301_v44 }
 0x1e9   :  { %v900_v40 = vadd.s32 4294967169, %v528_v34  ;;  %v869_v45 = vsel %vm853_vm14, %v852_v42, %v1145_v30  ;;  %v307_v51 = vadd.s32 %v306_v50, %v302_v46  ;;  %v532_v52 = vor.u32 8388608, %v531_v47 }
 0x1ea   :  { %911 = vst.msk [vmem:[%s1328_s5 + $0x30] sm:$0x1f] %vm854_vm8, %v869_v45  ;;  %v303_v45 = vadd.s32 %v1154_v38, %v1152_v22 }
 0x1eb   :  { %v534_v43 = vadd.s32 1, %v900_v40  ;;  %v308_v59 = vadd.s32 536870912, %v307_v51 }
 0x1ed   :  { %vm535_vm0 = vcmp.gt.s32.totalorder %v534_v43, 0  ;;  %v1191_v9 = vshrl.u32 %v308_v59, 30 }
 0x1ee   :  { %v536_v48 = vsel %vm535_vm0, %v534_v43, 0 }
 0x1ef   :  { %v538_v49 = vand.u32 31, %v536_v48  ;;  %v1174_v20 = vshrl.u32 %v536_v48, 5 }
 0x1f1   :  { %v1172_v53 = vsub.s32 32, %v538_v49  ;;  %v541_v54 = vshll.u32 %v951_v4, %v538_v49  ;;  %v544_v56 = vshll.u32 %v952_v6, %v538_v49  ;;  %v547_v57 = vshll.u32 %v953_v8, %v538_v49 }
 0x1f2   :  { %v550_v62 = vshll.u32 %v954_v10, %v538_v49  ;;  %v553_v0 = vshll.u32 %v955_v12, %v538_v49  ;;  %vm556_vm1 = vcmp.lt.s32.totalorder %v1174_v20, 1  ;;  %vm559_vm2 = vcmp.lt.s32.totalorder %v1174_v20, 4 }
 0x1f3   :  { %v542_v60 = vshrl.u32 %v952_v6, %v1172_v53  ;;  %v545_v61 = vshrl.u32 %v953_v8, %v1172_v53  ;;  %v548_v63 = vshrl.u32 %v954_v10, %v1172_v53  ;;  %v551_v1 = vshrl.u32 %v955_v12, %v1172_v53 }
 0x1f4   :  { %v554_v5 = vshrl.u32 %v956_v18, %v1172_v53  ;;  %v310_v10 = vshll.u32 %v1191_v9, 30  ;;  %v1206_v18 = vshll.u32 %v532_v52, 8  ;;  %vm558_vm3 = vcmp.lt.s32.totalorder %v1174_v20, 3 }
 0x1f5   :  { %v1193_v11 = vor.u32 %v542_v60, %v541_v54  ;;  %v1195_v6 = vor.u32 %v545_v61, %v544_v56  ;;  %v1197_v8 = vor.u32 %v548_v63, %v547_v57  ;;  %v552_v14 = vor.u32 %v551_v1, %v550_v62 }
 0x1f6   :  { %v555_v3 = vor.u32 %v554_v5, %v553_v0  ;;  %v311_v19 = vsub.s32 %v307_v51, %v310_v10  ;;  %vm557_vm4 = vcmp.lt.s32.totalorder %v1174_v20, 2  ;;  %v573_v29 = vand.u32 65535, %v1206_v18 }
 0x1f7   :  { %v564_v12 = vsel %vm556_vm1, %v1193_v11, %v1195_v6  ;;  %v565_v15 = vsel %vm559_vm2, %v552_v14, 920167782  ;;  %v568_v16 = vsel %vm556_vm1, %v1195_v6, %v1197_v8  ;;  %v574_v31 = vshrl.u32 %v1206_v18, 16 }
 0x1f8   :  { %v569_v17 = vsel %vm559_vm2, %v555_v3, 1326507024  ;;  %v566_v21 = vsel %vm558_vm3, %v1197_v8, %v565_v15  ;;  %vm312_vm5 = vcmp.lt.s32.totalorder %v311_v19, 0  ;;  %v313_v27 = vsub.s32 0, %v311_v19 }
 0x1f9   :  { %v567_v24 = vsel %vm557_vm4, %v564_v12, %v566_v21  ;;  %v570_v26 = vsel %vm558_vm3, %v552_v14, %v569_v17  ;;  %v540_v12 = vshrl.u32 %v951_v4, %v1172_v53  ;;  %v561_v15 = vsel %vm559_vm2, %v1197_v8, 2102212464 }
 0x1fa   :  { %v571_v28 = vsel %vm557_vm4, %v568_v16, %v570_v26  ;;  %v598_v34 = vshrl.u32 %v567_v24, 16  ;;  %v314_v35 = vsel %vm312_vm5, %v313_v27, %v311_v19  ;;  %v597_v36 = vand.u32 65535, %v567_v24 }
 0x1fb   :  { %v575_v32 = vand.u32 65535, %v571_v28  ;;  %v576_v33 = vshrl.u32 %v571_v28, 16  ;;  %v315_v37 = vclz %v314_v35  ;;  %v562_v4 = vsel %vm558_vm3, %v1195_v6, %v561_v15 }
 0x1fc   :  { %v600_v23 = vmul.u32 %v598_v34, %v573_v29  ;;  %v599_v46 = vmul.u32 %v597_v36, %v573_v29  ;;  %v601_v47 = vmul.u32 %v597_v36, %v574_v31  ;;  %v602_v60 = vmul.u32 %v598_v34, %v574_v31 }
 0x1fd   :  { %v578_v40 = vmul.u32 %v576_v33, %v573_v29  ;;  %v579_v41 = vmul.u32 %v575_v32, %v574_v31  ;;  %v895_v42 = vadd.s32 4294967294, %v315_v37  ;;  %v577_v43 = vmul.u32 %v575_v32, %v573_v29 }
 0x1fe   :  { %v603_v2 = vshll.u32 %v600_v23, 16  ;;  %v580_v48 = vmul.u32 %v576_v33, %v574_v31  ;;  %v605_v63 = vshll.u32 %v601_v47, 16  ;;  %v604_v26 = vshrl.u32 %v600_v23, 16 }
 0x1ff   :  { %v581_v44 = vshll.u32 %v578_v40, 16  ;;  %vm896_vm6 = vcmp.lt.s32.totalorder %v895_v42, 0  ;;  %v583_v49 = vshll.u32 %v579_v41, 16  ;;  %v582_v1 = vshrl.u32 %v578_v40, 16 }
 0x200   :  { %v318_v50 = vsel %vm896_vm6, 0, %v895_v42  ;;  %vm607_vm9 = vc.u32 %v599_v46, %v603_v2  ;;  %v609_v5 = vadd.s32 %v603_v2, %v599_v46  ;;  %v584_v21 = vshrl.u32 %v579_v41, 16 }
 0x201   :  { %vm585_vm7 = vc.u32 %v577_v43, %v581_v44  ;;  %v587_v52 = vadd.s32 %v581_v44, %v577_v43  ;;  %v319_v54 = vsub.s32 32, %v318_v50  ;;  %v320_v56 = vshll.u32 %v311_v19, %v318_v50 }
 0x202   :  { %v586_v51 = vsel %vm585_vm7, 1, %v957_v7  ;;  %v323_v57 = vsub.s32 4294967266, %v318_v50  ;;  %v608_v22 = vsel %vm607_vm9, 1, %v957_v7  ;;  %vm611_vm11 = vc.u32 %v609_v5, %v605_v63 }
 0x203   :  { %v588_v59 = vadd.s32 %v586_v51, %v580_v48  ;;  %vm589_vm10 = vc.u32 %v587_v52, %v583_v49  ;;  %v321_v38 = vshrl.u32 %v303_v45, %v319_v54  ;;  %v610_v14 = vadd.s32 %v608_v22, %v602_v60 }
 0x204   :  { %v324_v61 = vadd.s32 127, %v323_v57  ;;  %v590_v62 = vsel %vm589_vm10, 1, %v957_v7  ;;  %v612_v24 = vsel %vm611_vm11, 1, %v957_v7  ;;  %v560_v29 = vsel %vm556_vm1, %v540_v12, %v1193_v11 }
 0x205   :  { %v592_v0 = vadd.s32 %v590_v62, %v588_v59  ;;  %v322_v3 = vor.u32 %v321_v38, %v320_v56  ;;  %v614_v27 = vadd.s32 %v612_v24, %v610_v14  ;;  %v606_v8 = vshrl.u32 %v601_v47, 16 }
 0x206   :  { %v325_v10 = vshll.u32 %v324_v61, 23  ;;  %v613_v33 = vadd.s32 %v609_v5, %v605_v63  ;;  %v563_v7 = vsel %vm557_vm4, %v560_v29, %v562_v4  ;;  %v333_v47 = vsub.s32 4, %v1191_v9 }
 0x207   :  { %v593_v16 = vadd.s32 %v592_v0, %v582_v1  ;;  %v329_v19 = vcvt.s32.f32 %v322_v3  ;;  %v615_v31 = vadd.s32 %v614_v27, %v604_v26  ;;  %v617_v37 = vmul.u32 %v1206_v18, %v563_v7 }
 0x208   :  { %v326_v17 = vor.u32 4788187, %v325_v10  ;;  %v334_v51 = vsel %vm211_vm12, %v333_v47, %v1191_v9  ;;  %vm352_vm9 = vweird.f32 %v1045_v55  ;;  %vm526_vm10 = vcmp.lt.s32.totalorder %v1133_v13, 0  ;;  %v889_v47 = vld [vmem:[%s1327_s1 + $0x10] sm:$0x1f] }
 0x209   :  { %v594_v53 = vadd.s32 %v593_v16, %v584_v21  ;;  %v616_v34 = vadd.s32 %v615_v31, %v606_v8  ;;  %v336_v59 = vsel %vm1251_vm13, 0, %v334_v51  ;;  %vm1274_vm11 = vcmp.le.f32.partialorder %v524_v39, 0.7853982 }
 0x20a   :  { %v327_v28 = vand.u32 2147483647, %v326_v17  ;;  %v510_v62 = vadd.s32 3, %v336_v59  ;;  %v353_v5 = vand.u32 3, %v336_v59 }
 0x20b   :  { %vm619_vm15 = vc.u32 %v594_v53, %v613_v33  ;;  %v620_v6 = vadd.s32 1, %v616_v34  ;;  %v618_v14 = vadd.s32 %v613_v33, %v594_v53 }
 0x20c   :  { %v330_v32 = vmul.f32 %v329_v19, %v327_v28  ;;  %v511_v3 = vand.u32 3, %v510_v62  ;;  %vm355_vm2 = vcmp.eq.s32.totalorder %v353_v5, 0  ;;  %vm358_vm3 = vcmp.eq.s32.totalorder %v353_v5, 2 }
 0x20d   :  { %v621_v40 = vsel %vm619_vm15, %v620_v6, %v616_v34  ;;  %vm354_vm6 = vcmp.lt.s32.totalorder %v353_v5, 2 }
 0x20e   :  { %v331_v11 = vxor.u32 2147483648, %v330_v32  ;;  %v622_v23 = vadd.s32 %v621_v40, %v617_v37  ;;  %vm513_vm4 = vcmp.eq.s32.totalorder %v511_v3, 0  ;;  %vm516_vm5 = vcmp.eq.s32.totalorder %v511_v3, 2 }
 0x20f   :  { %vm512_vm7 = vcmp.lt.s32.totalorder %v511_v3, 2 }
 0x210   :  { %v332_v36 = vsel %vm211_vm12, %v331_v11, %v330_v32  ;;  %v623_v43 = vadd.s32 536870912, %v622_v23 }
 0x211   :  { %v335_v20 = vsel %vm1251_vm13, %v1045_v55, %v332_v36 }
 0x212   :  { %v337_v41 = vmul.f32 %v335_v20, %v335_v20  ;;  %v1261_v46 = vshrl.u32 %v623_v43, 30 }
 0x214   :  { %v338_v42 = vmul.f32 -0.001358992, %v337_v41  ;;  %v345_v58 = vmul.f32 -0.00019511016, %v337_v41  ;;  %v625_v18 = vshll.u32 %v1261_v46, 30  ;;  %v648_v39 = vsub.s32 4, %v1261_v46 }
 0x216   :  { %v339_v44 = vadd.f32 0.041655596, %v338_v42  ;;  %v346_v45 = vadd.f32 0.008332121, %v345_v58  ;;  %v626_v50 = vsub.s32 %v622_v23, %v625_v18  ;;  %v649_v18 = vsel %vm526_vm10, %v648_v39, %v1261_v46 }
 0x218   :  { %v340_v2 = vmul.f32 %v339_v44, %v337_v41  ;;  %v347_v48 = vmul.f32 %v346_v45, %v337_v41  ;;  %vm627_vm0 = vcmp.lt.s32.totalorder %v626_v50, 0  ;;  %v628_v56 = vsub.s32 0, %v626_v50  ;;  %v888_v45 = vld [vmem:[%s1327_s1 + $0x8] sm:$0x1f] }
 0x21a   :  { %v348_v49 = vadd.f32 -0.16666654, %v347_v48  ;;  %v341_v52 = vadd.f32 -0.4999988, %v340_v2  ;;  %v629_v57 = vsel %vm627_vm0, %v628_v56, %v626_v50  ;;  %vm667_vm0 = vweird.f32 %v1133_v13 }
 0x21b   :  { %v630_v60 = vclz %v629_v57 }
 0x21c   :  { %v349_v54 = vmul.f32 %v348_v49, %v337_v41  ;;  %v342_v22 = vmul.f32 %v341_v52, %v337_v41 }
 0x21d   :  { %v901_v61 = vadd.s32 4294967294, %v630_v60 }
 0x21e   :  { %v350_v38 = vadd.f32 1.0, %v349_v54  ;;  %v343_v63 = vadd.f32 1.0, %v342_v22  ;;  %v651_v54 = vsel %vm1274_vm11, 0, %v649_v18 }
 0x21f   :  { %vm902_vm1 = vcmp.lt.s32.totalorder %v901_v61, 0 }
 0x220   :  { %v351_v1 = vmul.f32 %v350_v38, %v335_v20  ;;  %v633_v0 = vsel %vm902_vm1, 0, %v901_v61  ;;  %v359_v16 = vxor.u32 2147483648, %v343_v63  ;;  %v823_v61 = vand.u32 3, %v651_v54 }
 0x221   :  { %v634_v9 = vsub.s32 32, %v633_v0  ;;  %v638_v10 = vsub.s32 4294967266, %v633_v0  ;;  %v635_v17 = vshll.u32 %v626_v50, %v633_v0 }
 0x222   :  { %v356_v15 = vxor.u32 2147483648, %v351_v1  ;;  %v360_v27 = vsel %vm358_vm3, %v359_v16, %v351_v1  ;;  %v518_v4 = vsel %vm516_vm5, %v359_v16, %v351_v1  ;;  %vm825_vm12 = vcmp.eq.s32.totalorder %v823_v61, 0 }
 0x223   :  { %v636_v12 = vshrl.u32 %v618_v14, %v634_v9  ;;  %v639_v19 = vadd.s32 127, %v638_v10  ;;  %vm828_vm13 = vcmp.eq.s32.totalorder %v823_v61, 2  ;;  %vm824_vm15 = vcmp.lt.s32.totalorder %v823_v61, 2 }
 0x224   :  { %v357_v26 = vsel %vm355_vm2, %v343_v63, %v356_v15  ;;  %v515_v29 = vsel %vm513_vm4, %v343_v63, %v356_v15  ;;  %v668_v9 = vadd.s32 3, %v651_v54 }
 0x225   :  { %v637_v21 = vor.u32 %v636_v12, %v635_v17  ;;  %v640_v24 = vshll.u32 %v639_v19, 23  ;;  %v361_v31 = vsel %vm354_vm6, %v357_v26, %v360_v27  ;;  %v519_v32 = vsel %vm512_vm7, %v515_v29, %v518_v4 }
 0x226   :  { %v362_v7 = vsel %vm352_vm9, nan, %v361_v31  ;;  %v520_v35 = vsel %vm352_vm9, nan, %v519_v32  ;;  %v669_v3 = vand.u32 3, %v668_v9 }
 0x227   :  { %v641_v28 = vor.u32 4788187, %v640_v24  ;;  %v644_v8 = vcvt.s32.f32 %v637_v21  ;;  %v363_v36 = vmul.f32 %v1145_v30, %v362_v7  ;;  %v521_v20 = vmul.f32 %v1145_v30, %v520_v35 }
 0x228   :  { %vm671_vm1 = vcmp.eq.s32.totalorder %v669_v3, 0  ;;  %vm674_vm2 = vcmp.eq.s32.totalorder %v669_v3, 2  ;;  %vm670_vm4 = vcmp.lt.s32.totalorder %v669_v3, 2 }
 0x229   :  { %v642_v53 = vand.u32 2147483647, %v641_v28  ;;  %v364_v42 = vmul.f32 0.1, %v363_v36  ;;  %v522_v58 = vmul.f32 0.1, %v521_v20 }
 0x22b   :  { %v645_v33 = vmul.f32 %v644_v8, %v642_v53  ;;  %v365_v49 = vadd.f32 %v888_v45, %v364_v42  ;;  %v523_v50 = vadd.f32 %v889_v47, %v522_v58 }
 0x22d   :  { %v646_v34 = vxor.u32 2147483648, %v645_v33  ;;  %v856_v22 = vsel %vm853_vm14, %v365_v49, %v888_v45  ;;  %v859_v38 = vsel %vm853_vm14, %v523_v50, %v889_v47 }
 0x22e   :  { %906 = vst.msk [vmem:[%s1328_s5 + $0x8] sm:$0x1f] %vm854_vm8, %v856_v22 }
 0x22f   :  { %v647_v6 = vsel %vm526_vm10, %v646_v34, %v645_v33  ;;  %907 = vst.msk [vmem:[%s1328_s5 + $0x10] sm:$0x1f] %vm854_vm8, %v859_v38 }
 0x230   :  { %v650_v37 = vsel %vm1274_vm11, %v1133_v13, %v647_v6 }
 0x231   :  { %v652_v40 = vmul.f32 %v650_v37, %v650_v37 }
 0x233   :  { %v653_v41 = vmul.f32 -0.001358992, %v652_v40  ;;  %v660_v23 = vmul.f32 -0.00019511016, %v652_v40 }
 0x235   :  { %v654_v43 = vadd.f32 0.041655596, %v653_v41  ;;  %v661_v44 = vadd.f32 0.008332121, %v660_v23 }
 0x237   :  { %v655_v2 = vmul.f32 %v654_v43, %v652_v40  ;;  %v662_v48 = vmul.f32 %v661_v44, %v652_v40 }
 0x239   :  { %v656_v51 = vadd.f32 -0.4999988, %v655_v2  ;;  %v663_v52 = vadd.f32 -0.16666654, %v662_v48 }
 0x23b   :  { %v657_v56 = vmul.f32 %v656_v51, %v652_v40  ;;  %v664_v57 = vmul.f32 %v663_v52, %v652_v40 }
 0x23d   :  { %v658_v59 = vadd.f32 1.0, %v657_v56  ;;  %v665_v60 = vadd.f32 1.0, %v664_v57 }
 0x23f   :  { %v666_v46 = vmul.f32 %v665_v60, %v650_v37  ;;  %v675_v62 = vxor.u32 2147483648, %v658_v59 }
 0x241   :  { %v672_v63 = vxor.u32 2147483648, %v666_v46  ;;  %v830_v0 = vsel %vm828_vm13, %v675_v62, %v666_v46  ;;  %v676_v24 = vsel %vm674_vm2, %v675_v62, %v666_v46 }
 0x243   :  { %v827_v1 = vsel %vm825_vm12, %v658_v59, %v672_v63  ;;  %v673_v16 = vsel %vm671_vm1, %v658_v59, %v672_v63 }
 0x244   :  { %v831_v5 = vsel %vm824_vm15, %v827_v1, %v830_v0  ;;  %v677_v26 = vsel %vm670_vm4, %v673_v16, %v676_v24 }
 0x245   :  { %v832_v14 = vsel %vm667_vm0, nan, %v831_v5  ;;  %v678_v4 = vsel %vm667_vm0, nan, %v677_v26 }
 0x246   :  { %948 = vrcp.f32 %v832_v14  ;;  %v844_v17 = vand.u32 2147483648, %v832_v14  ;;  %v842_v21 = vand.u32 2147483647, %v832_v14  ;;  %vm838_vm5 = vweird.f32 %v832_v14 }
 0x248   :  { %v845_v28 = vor.u32 1.1754944e-38, %v844_v17  ;;  %vm843_vm7 = vcmp.eq.f32.partialorder %v842_v21, 8.507059e+37 }
 0x24c   :  { %v949_v10 = vpop.eup %948 }
 0x24d   :  { %v834_v12 = vmul.f32 %v949_v10, %v832_v14  ;;  %vm839_vm3 = vweird.f32 %v949_v10 }
 0x24e   :  { %vm840_vm6 = vmor %vm838_vm5, %vm839_vm3 }
 0x24f   :  { %v835_v15 = vsub.f32 1.0, %v834_v12 }
 0x251   :  { %v836_v19 = vmul.f32 %v949_v10, %v835_v15 }
 0x253   :  { %v837_v27 = vadd.f32 %v949_v10, %v836_v19 }
 0x255   :  { %v841_v29 = vsel %vm840_vm6, %v949_v10, %v837_v27 }
 0x256   :  { %v846_v53 = vsel %vm843_vm7, %v845_v28, %v841_v29 }
 0x257   :  { %v847_v8 = vmul.f32 %v846_v53, %v678_v4 }
 0x259   :  { %v848_v31 = vmul.f32 %v1145_v30, %v847_v8 }
 0x25b   :  { %v849_v32 = vmul.f32 0.04, %v848_v31 }
 0x25d   :  { %v850_v33 = vadd.f32 %v1045_v55, %v849_v32 }
 0x25f   :  { %v866_v7 = vsel %vm853_vm14, %v850_v33, %v1045_v55 }
 0x260   :  { %910 = vst.msk [vmem:[%s1328_s5 + $0x28] sm:$0x1f] %vm854_vm8, %v866_v7 }

</bundles_post_ra>
